<compile_context>
chip_gen: v6e
topology: v6e:2x2x1
jax: 0.10.0
libtpu: 0.0.40
codegen_flags: <defaults>
</compile_context>

<pallas_src>
import functools

import jax
import jax.numpy as jnp
import numpy as np
from jax.experimental import pallas as pl
from jax.experimental.pallas import tpu as pltpu


def _node_fused_kernel(x_ref, m_ref, bw_ref, bias_ref, gamma_ref, beta_ref,
                       csum_ref, cbcast_ref, o_ref, stats_ref):
    """Fanin weighted-sum + ReLU + 3x3 conv (+bias) + train-mode BatchNorm2d.

    x_ref:      (TN, Cin, H, W*F)        batch block of x in its ORIGINAL layout
    m_ref:      (Cin, W*F, (W+2)*Cin)    fanin weights folded into selection matmuls
    bw_ref:     (3, (W+2)*Cin, W*Cout)   conv weight in row-banded block form
    bias_ref:   (1, W*Cout)              conv bias broadcast over w
    gamma_ref:  (1, Cout)                BN gamma
    beta_ref:   (1, Cout)                BN beta
    csum_ref:   (W*Cout, Cout)           lane-group -> channel sum matrix (factored)
    cbcast_ref: (Cout, W*Cout)           channel -> lane-group broadcast matrix
    o_ref:      (N*H, W*Cout)            VMEM-resident output (constant block index)
    stats_ref:  (2, W*Cout)              scratch: per-lane [sum; sumsq] accumulator
    """
    b = pl.program_id(0)
    nb = pl.num_programs(0)

    TN, Cin, H, WF = x_ref.shape
    M = TN * H
    WCout = o_ref.shape[1]
    Cout = csum_ref.shape[1]
    W = WCout // Cout

    @pl.when(b == 0)
    def _():
        stats_ref[...] = jnp.zeros_like(stats_ref)

    # --- fanin weighted sum + NCHW->(width-major, channel-minor) relayout + width
    # zero-padding, folded into Cin selection matmuls.  M = TN*H rows per matmul.
    xb = x_ref[...]
    acc = jnp.dot(xb[:, 0].reshape(M, WF), m_ref[0],
                  preferred_element_type=jnp.float32)
    for c in range(1, Cin):
        acc = acc + jnp.dot(xb[:, c].reshape(M, WF), m_ref[c],
                            preferred_element_type=jnp.float32)
    act = jnp.maximum(acc, 0.0).astype(bw_ref.dtype)      # (M, (W+2)*Cin), ReLU

    # --- 3x3 conv (pad=1, stride=1): 3 row-banded matmuls + XLU row rolls.
    c0 = jnp.dot(act, bw_ref[0], preferred_element_type=jnp.float32)
    c1 = jnp.dot(act, bw_ref[1], preferred_element_type=jnp.float32)
    c2 = jnp.dot(act, bw_ref[2], preferred_element_type=jnp.float32)

    # Row h of each image needs c0[h-1] and c2[h+1]; rolls wrap across image
    # boundaries, so zero h==0 / h==H-1 rows (iota built 3-D to avoid an int mod).
    h_idx = jax.lax.broadcasted_iota(jnp.int32, (TN, H, WCout), 1).reshape(M, WCout)
    top = jnp.where(h_idx == 0, 0.0, pltpu.roll(c0, shift=1, axis=0))
    bot = jnp.where(h_idx == H - 1, 0.0, pltpu.roll(c2, shift=M - 1, axis=0))
    out2d = bias_ref[...] + c1 + top + bot                 # (M, W*Cout), 128-lane dense

    row0 = pl.multiple_of(b * M, M)
    o_ref[pl.ds(row0, M), :] = out2d

    # --- BN partial statistics on the in-register conv output (no re-read of o_ref).
    ps = jnp.sum(out2d, axis=0, keepdims=True)
    pss = jnp.sum(out2d * out2d, axis=0, keepdims=True)
    stats_ref[...] += jnp.concatenate([ps, pss], axis=0)

    # --- finalize train-mode BatchNorm2d on the resident output (single pass).
    @pl.when(b == nb - 1)
    def _():
        cnt = float(o_ref.shape[0] * W)                    # N*H*W samples per channel
        ch = jnp.dot(stats_ref[...], csum_ref[...],
                     preferred_element_type=jnp.float32)   # (2, Cout): [sum; sumsq]
        mean = ch[0:1] / cnt
        var = ch[1:2] / cnt - mean * mean                  # biased (train-mode) variance
        scale = gamma_ref[...] * jax.lax.rsqrt(var + 1e-5)       # (1, Cout)
        shift = beta_ref[...] - mean * scale                     # (1, Cout)
        lane = jnp.dot(jnp.concatenate([scale, shift], axis=0), cbcast_ref[...],
                       preferred_element_type=jnp.float32)       # (2, W*Cout)
        o_ref[...] = o_ref[...] * lane[0:1] + lane[1:2]


@functools.partial(jax.jit, static_argnames=("compute_dtype",))
def node_forward(x_nchwf, w_fanin, conv_w, conv_b, gamma, beta,
                 compute_dtype=jnp.bfloat16):
    """x_nchwf: (N, C, H, W, F) float32.  Returns (N, Cout, H, W) float32."""
    N, C, H, W, F_ = x_nchwf.shape
    Cout = conv_w.shape[0]
    WCout = W * Cout

    assert H % 8 == 0, "H must be a multiple of 8 (sublane-aligned rows)"
    assert WCout % 128 == 0, "W*Cout must be a multiple of 128 (lane-dense output)"
    # Resident output must fit VMEM; for larger shapes raise vmem_limit_bytes or tile
    # the BN finalize instead of keeping the whole output resident.
    assert N * H * WCout * 4 <= 24 * 1024 * 1024, "resident output too large for VMEM"

    # Batch blocking: TN images per grid step -> matmul M = TN*H rows (MXU fill),
    # ~256 rows targets the v6e/v7x MXU height and is harmless on v5e.
    tn = max(1, min(N, max(1, 256 // H)))
    while N % tn:
        tn -= 1

    # x in its original layout: a free contiguous reshape only, no HBM transpose.
    x_r = x_nchwf.reshape(N, C, H, W * F_).astype(compute_dtype)

    # M[c, w*F+f, q*C+c'] = w[f]*(c'==c)*(q==w+1): folds the fanin reduction, the
    # channel->lane relayout, and the width zero-padding into one matmul per channel.
    w_vec = w_fanin.reshape(F_).astype(jnp.float32)
    pmat = np.zeros((W, W + 2), np.float32)
    pmat[np.arange(W), np.arange(W) + 1] = 1.0
    m_mat = jnp.einsum('f,sc,wq->swfqc', w_vec, jnp.eye(C, dtype=jnp.float32),
                       jnp.asarray(pmat))
    m_mat = m_mat.reshape(C, W * F_, (W + 2) * C).astype(compute_dtype)

    # Conv weight OIHW -> row-banded block form BW[kh, q*Cin+ci, w*Cout+co].
    w_hwio = jnp.transpose(conv_w.astype(jnp.float32), (2, 3, 1, 0))   # (3,3,Cin,Cout)
    sel = np.zeros((3, W + 2, W), np.float32)
    for kw in range(3):
        sel[kw, np.arange(W) + kw, np.arange(W)] = 1.0
    bw = jnp.einsum('kqw,hkic->hqiwc', jnp.asarray(sel), w_hwio)
    bw = bw.reshape(3, (W + 2) * C, WCout).astype(compute_dtype)

    bias_lane = jnp.tile(conv_b.astype(jnp.float32), W).reshape(1, WCout)
    gamma_row = gamma.astype(jnp.float32).reshape(1, Cout)
    beta_row = beta.astype(jnp.float32).reshape(1, Cout)

    # Factored channel-reduce / broadcast matrices (replace dense (WCout, WCout) cred).
    eye_c = np.eye(Cout, dtype=np.float32)
    csum = jnp.asarray(np.tile(eye_c, (W, 1)))      # (W*Cout, Cout)
    cbcast = jnp.asarray(np.tile(eye_c, (1, W)))    # (Cout, W*Cout)

    y = pl.pallas_call(
        _node_fused_kernel,
        out_shape=jax.ShapeDtypeStruct((N * H, WCout), jnp.float32),
        grid_spec=pltpu.PrefetchScalarGridSpec(
            num_scalar_prefetch=0,
            grid=(N // tn,),
            in_specs=[
                pl.BlockSpec((tn, C, H, W * F_), lambda b: (b, 0, 0, 0)),
                pl.BlockSpec((C, W * F_, (W + 2) * C), lambda b: (0, 0, 0)),
                pl.BlockSpec((3, (W + 2) * C, WCout), lambda b: (0, 0, 0)),
                pl.BlockSpec((1, WCout), lambda b: (0, 0)),
                pl.BlockSpec((1, Cout), lambda b: (0, 0)),
                pl.BlockSpec((1, Cout), lambda b: (0, 0)),
                pl.BlockSpec((WCout, Cout), lambda b: (0, 0)),
                pl.BlockSpec((Cout, WCout), lambda b: (0, 0)),
            ],
            out_specs=pl.BlockSpec((N * H, WCout), lambda b: (0, 0)),
            scratch_shapes=[pltpu.VMEM((2, WCout), jnp.float32)],
        ),
        # Sequential batch grid: the output block stays VMEM-resident across the grid
        # and the cross-batch BN statistics are finalized on the last step.
        compiler_params=pltpu.CompilerParams(dimension_semantics=("arbitrary",)),
    )(x_r, m_mat, bw, bias_lane, gamma_row, beta_row, csum, cbcast)

    return jnp.transpose(y.reshape(N, H, W, Cout), (0, 3, 1, 2))       # NCHW


def node_reference(x_nchwf, w_fanin, conv_w, conv_b, gamma, beta):
    """Pure-JAX reference for the same forward pass (correctness check)."""
    xr = jnp.einsum('nchwf,f->nchw', x_nchwf, w_fanin[0])
    xr = jax.nn.relu(xr)
    y = jax.lax.conv_general_dilated(
        xr, conv_w, window_strides=(1, 1), padding='SAME',
        dimension_numbers=('NCHW', 'OIHW', 'NCHW'))
    y = y + conv_b.reshape(1, -1, 1, 1)
    mean = jnp.mean(y, axis=(0, 2, 3), keepdims=True)
    var = jnp.mean((y - mean) ** 2, axis=(0, 2, 3), keepdims=True)
    return ((y - mean) * jax.lax.rsqrt(var + 1e-5)
            * gamma.reshape(1, -1, 1, 1) + beta.reshape(1, -1, 1, 1))


if __name__ == "__main__":
    # Small shapes consistent with Node: x is (N, C, H, W, F), fin = F.
    N, Cin, H, W, F_ = 2, 4, 16, 16, 3
    Cout = 8  # planes

    key = jax.random.PRNGKey(0)
    kx, kw, kcw, kcb = jax.random.split(key, 4)

    x = jax.random.normal(kx, (N, Cin, H, W, F_), dtype=jnp.float32)
    w_fanin = jax.random.normal(kw, (1, F_), dtype=jnp.float32)                  # (1, fin)
    conv_w = 0.1 * jax.random.normal(kcw, (Cout, Cin, 3, 3), dtype=jnp.float32)  # OIHW
    conv_b = 0.1 * jax.random.normal(kcb, (Cout,), dtype=jnp.float32)
    gamma = jnp.ones((Cout,), dtype=jnp.float32)
    beta = jnp.zeros((Cout,), dtype=jnp.float32)

    ref = node_reference(x, w_fanin, conv_w, conv_b, gamma, beta)

    # f32 MXU operands: tight structural/numerical check.
    out_f32 = jax.block_until_ready(
        node_forward(x, w_fanin, conv_w, conv_b, gamma, beta,
                     compute_dtype=jnp.float32))
    np.testing.assert_allclose(np.asarray(out_f32), np.asarray(ref),
                               atol=2e-4, rtol=2e-4)

    # bf16 MXU operands (fast path, f32 accumulation): bf16-appropriate tolerance.
    out_bf16 = jax.block_until_ready(
        node_forward(x, w_fanin, conv_w, conv_b, gamma, beta))
    np.testing.assert_allclose(np.asarray(out_bf16), np.asarray(ref),
                               atol=3e-2, rtol=3e-2)

    # TODO(synk): monitor!=None running-"strengths" statistics is Python-side module
    # bookkeeping and is not translated; depthwise (SeparableConv) and downsample
    # (stride=2) variants are not implemented.
    # TODO(synk): v7x 2-TensorCore split (CORE_PARALLEL grid + partial BN sums in
    # VMEM_SHARED) not implemented; single-core resident-output path is used.
    print("KERNEL_OK")
</pallas_src>

<mosaic_0001>
module attributes {stable_mosaic.version = 11 : i64} {
  func.func @_node_fused_kernel(%arg0: i32, %arg1: memref<2x4x16x48xf32, #tpu.memory_space<vmem>>, %arg2: memref<4x48x72xf32, #tpu.memory_space<vmem>>, %arg3: memref<3x72x128xf32, #tpu.memory_space<vmem>>, %arg4: memref<1x128xf32, #tpu.memory_space<vmem>>, %arg5: memref<1x8xf32, #tpu.memory_space<vmem>>, %arg6: memref<1x8xf32, #tpu.memory_space<vmem>>, %arg7: memref<128x8xf32, #tpu.memory_space<vmem>>, %arg8: memref<8x128xf32, #tpu.memory_space<vmem>>, %arg9: memref<32x128xf32, #tpu.memory_space<vmem>>, %arg10: memref<2x128xf32, #tpu.memory_space<vmem>>) attributes {dimension_semantics = [#tpu.dimension_semantics<arbitrary>], iteration_bounds = array<i64: 1>, scalar_prefetch = 0 : i64, scratch_operands = 1 : i64, tpu.core_type = #tpu.core_type<tc>, window_params = [{transform_indices = @transform_0, window_bounds = array<i64: 2, 4, 16, 48>}, {pipeline_mode = #tpu.pipeline_mode<synchronous>, transform_indices = @transform_1, window_bounds = array<i64: 4, 48, 72>}, {pipeline_mode = #tpu.pipeline_mode<synchronous>, transform_indices = @transform_2, window_bounds = array<i64: 3, 72, 128>}, {pipeline_mode = #tpu.pipeline_mode<synchronous>, transform_indices = @transform_3, window_bounds = array<i64: 1, 128>}, {pipeline_mode = #tpu.pipeline_mode<synchronous>, transform_indices = @transform_4, window_bounds = array<i64: 1, 8>}, {pipeline_mode = #tpu.pipeline_mode<synchronous>, transform_indices = @transform_5, window_bounds = array<i64: 1, 8>}, {pipeline_mode = #tpu.pipeline_mode<synchronous>, transform_indices = @transform_6, window_bounds = array<i64: 128, 8>}, {pipeline_mode = #tpu.pipeline_mode<synchronous>, transform_indices = @transform_7, window_bounds = array<i64: 8, 128>}, {pipeline_mode = #tpu.pipeline_mode<synchronous>, transform_indices = @transform_8, window_bounds = array<i64: 32, 128>}]} {
    %c0_i32 = arith.constant 0 : i32
    %0 = arith.cmpi eq, %arg0, %c0_i32 : i32
    %1 = arith.extui %0 : i1 to i32
    %c0_i32_0 = arith.constant 0 : i32
    %2 = arith.cmpi ne, %1, %c0_i32_0 : i32
    scf.if %2 {
      %cst_43 = arith.constant 0.000000e+00 : f32
      %75 = vector.broadcast %cst_43 : f32 to vector<2x128xf32>
      %c0_44 = arith.constant 0 : index
      %c0_45 = arith.constant 0 : index
      %76 = vector.load %arg10[%c0_44, %c0_45] : memref<2x128xf32, #tpu.memory_space<vmem>>, vector<2x128xf32>
      tpu.vector_store %arg10[%c0_44, %c0_45], %75 {strides = array<i32>} : memref<2x128xf32, #tpu.memory_space<vmem>>, vector<2x128xf32>,
    } else {
    }
    %c0 = arith.constant 0 : index
    %c0_1 = arith.constant 0 : index
    %c0_2 = arith.constant 0 : index
    %c0_3 = arith.constant 0 : index
    %3 = vector.load %arg1[%c0, %c0_1, %c0_2, %c0_3] : memref<2x4x16x48xf32, #tpu.memory_space<vmem>>, vector<2x4x16x48xf32>
    %4 = vector.extract_strided_slice %3 {offsets = [0, 0, 0, 0], sizes = [2, 1, 16, 48], strides = [1, 1, 1, 1]} : vector<2x4x16x48xf32> to vector<2x1x16x48xf32>
    %5 = vector.shape_cast %4 : vector<2x1x16x48xf32> to vector<2x16x48xf32>
    %6 = vector.shape_cast %5 : vector<2x16x48xf32> to vector<32x48xf32>
    %c0_4 = arith.constant 0 : index
    %c0_5 = arith.constant 0 : index
    %c0_6 = arith.constant 0 : index
    %7 = vector.load %arg2[%c0_4, %c0_5, %c0_6] : memref<4x48x72xf32, #tpu.memory_space<vmem>>, vector<1x48x72xf32>
    %8 = vector.shape_cast %7 : vector<1x48x72xf32> to vector<48x72xf32>
    %cst = arith.constant dense<0.000000e+00> : vector<32x72xf32>
    %9 = tpu.matmul %6, %8, %cst {dimension_numbers = #tpu.dot_dimension_numbers<[1], [0], [0], [1], [0, 0, 1, 1], [], []>} : vector<32x48xf32>, vector<48x72xf32>, vector<32x72xf32> -> vector<32x72xf32>
    %10 = vector.extract_strided_slice %3 {offsets = [0, 1, 0, 0], sizes = [2, 1, 16, 48], strides = [1, 1, 1, 1]} : vector<2x4x16x48xf32> to vector<2x1x16x48xf32>
    %11 = vector.shape_cast %10 : vector<2x1x16x48xf32> to vector<2x16x48xf32>
    %12 = vector.shape_cast %11 : vector<2x16x48xf32> to vector<32x48xf32>
    %c1 = arith.constant 1 : index
    %c0_7 = arith.constant 0 : index
    %c0_8 = arith.constant 0 : index
    %13 = vector.load %arg2[%c1, %c0_7, %c0_8] : memref<4x48x72xf32, #tpu.memory_space<vmem>>, vector<1x48x72xf32>
    %14 = vector.shape_cast %13 : vector<1x48x72xf32> to vector<48x72xf32>
    %cst_9 = arith.constant dense<0.000000e+00> : vector<32x72xf32>
    %15 = tpu.matmul %12, %14, %cst_9 {dimension_numbers = #tpu.dot_dimension_numbers<[1], [0], [0], [1], [0, 0, 1, 1], [], []>} : vector<32x48xf32>, vector<48x72xf32>, vector<32x72xf32> -> vector<32x72xf32>
    %16 = arith.addf %9, %15 : vector<32x72xf32>
    %17 = vector.extract_strided_slice %3 {offsets = [0, 2, 0, 0], sizes = [2, 1, 16, 48], strides = [1, 1, 1, 1]} : vector<2x4x16x48xf32> to vector<2x1x16x48xf32>
    %18 = vector.shape_cast %17 : vector<2x1x16x48xf32> to vector<2x16x48xf32>
    %19 = vector.shape_cast %18 : vector<2x16x48xf32> to vector<32x48xf32>
    %c2 = arith.constant 2 : index
    %c0_10 = arith.constant 0 : index
    %c0_11 = arith.constant 0 : index
    %20 = vector.load %arg2[%c2, %c0_10, %c0_11] : memref<4x48x72xf32, #tpu.memory_space<vmem>>, vector<1x48x72xf32>
    %21 = vector.shape_cast %20 : vector<1x48x72xf32> to vector<48x72xf32>
    %cst_12 = arith.constant dense<0.000000e+00> : vector<32x72xf32>
    %22 = tpu.matmul %19, %21, %cst_12 {dimension_numbers = #tpu.dot_dimension_numbers<[1], [0], [0], [1], [0, 0, 1, 1], [], []>} : vector<32x48xf32>, vector<48x72xf32>, vector<32x72xf32> -> vector<32x72xf32>
    %23 = arith.addf %16, %22 : vector<32x72xf32>
    %24 = vector.extract_strided_slice %3 {offsets = [0, 3, 0, 0], sizes = [2, 1, 16, 48], strides = [1, 1, 1, 1]} : vector<2x4x16x48xf32> to vector<2x1x16x48xf32>
    %25 = vector.shape_cast %24 : vector<2x1x16x48xf32> to vector<2x16x48xf32>
    %26 = vector.shape_cast %25 : vector<2x16x48xf32> to vector<32x48xf32>
    %c3 = arith.constant 3 : index
    %c0_13 = arith.constant 0 : index
    %c0_14 = arith.constant 0 : index
    %27 = vector.load %arg2[%c3, %c0_13, %c0_14] : memref<4x48x72xf32, #tpu.memory_space<vmem>>, vector<1x48x72xf32>
    %28 = vector.shape_cast %27 : vector<1x48x72xf32> to vector<48x72xf32>
    %cst_15 = arith.constant dense<0.000000e+00> : vector<32x72xf32>
    %29 = tpu.matmul %26, %28, %cst_15 {dimension_numbers = #tpu.dot_dimension_numbers<[1], [0], [0], [1], [0, 0, 1, 1], [], []>} : vector<32x48xf32>, vector<48x72xf32>, vector<32x72xf32> -> vector<32x72xf32>
    %30 = arith.addf %23, %29 : vector<32x72xf32>
    %cst_16 = arith.constant 0.000000e+00 : f32
    %31 = vector.broadcast %cst_16 : f32 to vector<32x72xf32>
    %32 = arith.maximumf %30, %31 : vector<32x72xf32>
    %c0_17 = arith.constant 0 : index
    %c0_18 = arith.constant 0 : index
    %c0_19 = arith.constant 0 : index
    %33 = vector.load %arg3[%c0_17, %c0_18, %c0_19] : memref<3x72x128xf32, #tpu.memory_space<vmem>>, vector<1x72x128xf32>
    %34 = vector.shape_cast %33 : vector<1x72x128xf32> to vector<72x128xf32>
    %cst_20 = arith.constant dense<0.000000e+00> : vector<32x128xf32>
    %35 = tpu.matmul %32, %34, %cst_20 {dimension_numbers = #tpu.dot_dimension_numbers<[1], [0], [0], [1], [0, 0, 1, 1], [], []>} : vector<32x72xf32>, vector<72x128xf32>, vector<32x128xf32> -> vector<32x128xf32>
    %c1_21 = arith.constant 1 : index
    %c0_22 = arith.constant 0 : index
    %c0_23 = arith.constant 0 : index
    %36 = vector.load %arg3[%c1_21, %c0_22, %c0_23] : memref<3x72x128xf32, #tpu.memory_space<vmem>>, vector<1x72x128xf32>
    %37 = vector.shape_cast %36 : vector<1x72x128xf32> to vector<72x128xf32>
    %cst_24 = arith.constant dense<0.000000e+00> : vector<32x128xf32>
    %38 = tpu.matmul %32, %37, %cst_24 {dimension_numbers = #tpu.dot_dimension_numbers<[1], [0], [0], [1], [0, 0, 1, 1], [], []>} : vector<32x72xf32>, vector<72x128xf32>, vector<32x128xf32> -> vector<32x128xf32>
    %c2_25 = arith.constant 2 : index
    %c0_26 = arith.constant 0 : index
    %c0_27 = arith.constant 0 : index
    %39 = vector.load %arg3[%c2_25, %c0_26, %c0_27] : memref<3x72x128xf32, #tpu.memory_space<vmem>>, vector<1x72x128xf32>
    %40 = vector.shape_cast %39 : vector<1x72x128xf32> to vector<72x128xf32>
    %cst_28 = arith.constant dense<0.000000e+00> : vector<32x128xf32>
    %41 = tpu.matmul %32, %40, %cst_28 {dimension_numbers = #tpu.dot_dimension_numbers<[1], [0], [0], [1], [0, 0, 1, 1], [], []>} : vector<32x72xf32>, vector<72x128xf32>, vector<32x128xf32> -> vector<32x128xf32>
    %42 = tpu.iota {dimensions = array<i32: 1>} : vector<2x16x128xi32>
    %43 = vector.shape_cast %42 : vector<2x16x128xi32> to vector<32x128xi32>
    %c0_i32_29 = arith.constant 0 : i32
    %44 = vector.broadcast %c0_i32_29 : i32 to vector<32x128xi32>
    %45 = arith.cmpi eq, %43, %44 : vector<32x128xi32>
    %c1_i32 = arith.constant 1 : i32
    %46 = tpu.dynamic_rotate %35 by %c1_i32 dim 0 : vector<32x128xf32>, i32 -> vector<32x128xf32>
    %cst_30 = arith.constant 0.000000e+00 : f32
    %47 = vector.broadcast %cst_30 : f32 to vector<32x128xf32>
    %48 = arith.select %45, %47, %46 : vector<32x128xi1>, vector<32x128xf32>
    %c15_i32 = arith.constant 15 : i32
    %49 = vector.broadcast %c15_i32 : i32 to vector<32x128xi32>
    %50 = arith.cmpi eq, %43, %49 : vector<32x128xi32>
    %c31_i32 = arith.constant 31 : i32
    %51 = tpu.dynamic_rotate %41 by %c31_i32 dim 0 : vector<32x128xf32>, i32 -> vector<32x128xf32>
    %cst_31 = arith.constant 0.000000e+00 : f32
    %52 = vector.broadcast %cst_31 : f32 to vector<32x128xf32>
    %53 = arith.select %50, %52, %51 : vector<32x128xi1>, vector<32x128xf32>
    %c0_32 = arith.constant 0 : index
    %c0_33 = arith.constant 0 : index
    %54 = vector.load %arg4[%c0_32, %c0_33] : memref<1x128xf32, #tpu.memory_space<vmem>>, vector<1x128xf32>
    %55 = vector.broadcast %54 : vector<1x128xf32> to vector<32x128xf32>
    %56 = arith.addf %55, %38 : vector<32x128xf32>
    %57 = arith.addf %56, %48 : vector<32x128xf32>
    %58 = arith.addf %57, %53 : vector<32x128xf32>
    %c32_i32 = arith.constant 32 : i32
    %59 = arith.muli %arg0, %c32_i32 : i32
    %60 = tpu.assume_multiple %59, 32 : i32
    %61 = arith.index_cast %60 : i32 to index
    %c0_34 = arith.constant 0 : index
    %62 = vector.load %arg9[%61, %c0_34] : memref<32x128xf32, #tpu.memory_space<vmem>>, vector<32x128xf32>
    tpu.vector_store %arg9[%61, %c0_34], %58 {strides = array<i32>} : memref<32x128xf32, #tpu.memory_space<vmem>>, vector<32x128xf32>,
    %cst_35 = arith.constant dense<0.000000e+00> : vector<128xf32>
    %63 = vector.multi_reduction <add>, %58, %cst_35 [0] : vector<32x128xf32> to vector<128xf32>
    %64 = vector.shape_cast %63 : vector<128xf32> to vector<1x128xf32>
    %65 = arith.mulf %58, %58 : vector<32x128xf32>
    %cst_36 = arith.constant dense<0.000000e+00> : vector<128xf32>
    %66 = vector.multi_reduction <add>, %65, %cst_36 [0] : vector<32x128xf32> to vector<128xf32>
    %67 = vector.shape_cast %66 : vector<128xf32> to vector<1x128xf32>
    %c0_37 = arith.constant 0 : index
    %c0_38 = arith.constant 0 : index
    %68 = vector.load %arg10[%c0_37, %c0_38] : memref<2x128xf32, #tpu.memory_space<vmem>>, vector<2x128xf32>
    %69 = tpu.concatenate %64, %67 in 0 : vector<1x128xf32>, vector<1x128xf32> -> vector<2x128xf32>
    %70 = arith.addf %68, %69 : vector<2x128xf32>
    %c0_39 = arith.constant 0 : index
    %c0_40 = arith.constant 0 : index
    %71 = vector.load %arg10[%c0_39, %c0_40] : memref<2x128xf32, #tpu.memory_space<vmem>>, vector<2x128xf32>
    tpu.vector_store %arg10[%c0_39, %c0_40], %70 {strides = array<i32>} : memref<2x128xf32, #tpu.memory_space<vmem>>, vector<2x128xf32>,
    %c0_i32_41 = arith.constant 0 : i32
    %72 = arith.cmpi eq, %arg0, %c0_i32_41 : i32
    %73 = arith.extui %72 : i1 to i32
    %c0_i32_42 = arith.constant 0 : i32
    %74 = arith.cmpi ne, %73, %c0_i32_42 : i32
    scf.if %74 {
      %c0_43 = arith.constant 0 : index
      %c0_44 = arith.constant 0 : index
      %75 = vector.load %arg10[%c0_43, %c0_44] : memref<2x128xf32, #tpu.memory_space<vmem>>, vector<2x128xf32>
      %c0_45 = arith.constant 0 : index
      %c0_46 = arith.constant 0 : index
      %76 = vector.load %arg7[%c0_45, %c0_46] : memref<128x8xf32, #tpu.memory_space<vmem>>, vector<128x8xf32>
      %cst_47 = arith.constant dense<0.000000e+00> : vector<2x8xf32>
      %77 = tpu.matmul %75, %76, %cst_47 {dimension_numbers = #tpu.dot_dimension_numbers<[1], [0], [0], [1], [0, 0, 1, 1], [], []>} : vector<2x128xf32>, vector<128x8xf32>, vector<2x8xf32> -> vector<2x8xf32>
      %78 = vector.extract_strided_slice %77 {offsets = [0, 0], sizes = [1, 8], strides = [1, 1]} : vector<2x8xf32> to vector<1x8xf32>
      %cst_48 = arith.constant 5.120000e+02 : f32
      %79 = vector.broadcast %cst_48 : f32 to vector<1x8xf32>
      %80 = arith.divf %78, %79 : vector<1x8xf32>
      %81 = vector.extract_strided_slice %77 {offsets = [1, 0], sizes = [1, 8], strides = [1, 1]} : vector<2x8xf32> to vector<1x8xf32>
      %cst_49 = arith.constant 5.120000e+02 : f32
      %82 = vector.broadcast %cst_49 : f32 to vector<1x8xf32>
      %83 = arith.divf %81, %82 : vector<1x8xf32>
      %84 = arith.mulf %80, %80 : vector<1x8xf32>
      %85 = arith.subf %83, %84 : vector<1x8xf32>
      %c0_50 = arith.constant 0 : index
      %c0_51 = arith.constant 0 : index
      %86 = vector.load %arg5[%c0_50, %c0_51] : memref<1x8xf32, #tpu.memory_space<vmem>>, vector<1x8xf32>
      %cst_52 = arith.constant 9.99999974E-6 : f32
      %87 = vector.broadcast %cst_52 : f32 to vector<1x8xf32>
      %88 = arith.addf %85, %87 : vector<1x8xf32>
      %89 = math.rsqrt %88 : vector<1x8xf32>
      %90 = arith.mulf %86, %89 : vector<1x8xf32>
      %c0_53 = arith.constant 0 : index
      %c0_54 = arith.constant 0 : index
      %91 = vector.load %arg6[%c0_53, %c0_54] : memref<1x8xf32, #tpu.memory_space<vmem>>, vector<1x8xf32>
      %92 = arith.mulf %80, %90 : vector<1x8xf32>
      %93 = arith.subf %91, %92 : vector<1x8xf32>
      %94 = tpu.concatenate %90, %93 in 0 : vector<1x8xf32>, vector<1x8xf32> -> vector<2x8xf32>
      %c0_55 = arith.constant 0 : index
      %c0_56 = arith.constant 0 : index
      %95 = vector.load %arg8[%c0_55, %c0_56] : memref<8x128xf32, #tpu.memory_space<vmem>>, vector<8x128xf32>
      %cst_57 = arith.constant dense<0.000000e+00> : vector<2x128xf32>
      %96 = tpu.matmul %94, %95, %cst_57 {dimension_numbers = #tpu.dot_dimension_numbers<[1], [0], [0], [1], [0, 0, 1, 1], [], []>} : vector<2x8xf32>, vector<8x128xf32>, vector<2x128xf32> -> vector<2x128xf32>
      %c0_58 = arith.constant 0 : index
      %c0_59 = arith.constant 0 : index
      %97 = vector.load %arg9[%c0_58, %c0_59] : memref<32x128xf32, #tpu.memory_space<vmem>>, vector<32x128xf32>
      %98 = vector.extract_strided_slice %96 {offsets = [0, 0], sizes = [1, 128], strides = [1, 1]} : vector<2x128xf32> to vector<1x128xf32>
      %99 = vector.broadcast %98 : vector<1x128xf32> to vector<32x128xf32>
      %100 = arith.mulf %97, %99 : vector<32x128xf32>
      %101 = vector.extract_strided_slice %96 {offsets = [1, 0], sizes = [1, 128], strides = [1, 1]} : vector<2x128xf32> to vector<1x128xf32>
      %102 = vector.broadcast %101 : vector<1x128xf32> to vector<32x128xf32>
      %103 = arith.addf %100, %102 : vector<32x128xf32>
      %c0_60 = arith.constant 0 : index
      %c0_61 = arith.constant 0 : index
      %104 = vector.load %arg9[%c0_60, %c0_61] : memref<32x128xf32, #tpu.memory_space<vmem>>, vector<32x128xf32>
      tpu.vector_store %arg9[%c0_60, %c0_61], %103 {strides = array<i32>} : memref<32x128xf32, #tpu.memory_space<vmem>>, vector<32x128xf32>,
    } else {
    }
    return
  }
  func.func @transform_0(%arg0: i32) -> (i32, i32, i32, i32) {
    %c0_i32 = arith.constant 0 : i32
    %c0_i32_0 = arith.constant 0 : i32
    %c0_i32_1 = arith.constant 0 : i32
    %c0_i32_2 = arith.constant 0 : i32
    return %arg0, %c0_i32, %c0_i32_0, %c0_i32_1 : i32, i32, i32, i32
  }
  func.func @transform_1(%arg0: i32) -> (i32, i32, i32) {
    %c0_i32 = arith.constant 0 : i32
    %c0_i32_0 = arith.constant 0 : i32
    %c0_i32_1 = arith.constant 0 : i32
    %c0_i32_2 = arith.constant 0 : i32
    return %c0_i32, %c0_i32_0, %c0_i32_1 : i32, i32, i32
  }
  func.func @transform_2(%arg0: i32) -> (i32, i32, i32) {
    %c0_i32 = arith.constant 0 : i32
    %c0_i32_0 = arith.constant 0 : i32
    %c0_i32_1 = arith.constant 0 : i32
    %c0_i32_2 = arith.constant 0 : i32
    return %c0_i32, %c0_i32_0, %c0_i32_1 : i32, i32, i32
  }
  func.func @transform_3(%arg0: i32) -> (i32, i32) {
    %c0_i32 = arith.constant 0 : i32
    %c0_i32_0 = arith.constant 0 : i32
    %c0_i32_1 = arith.constant 0 : i32
    return %c0_i32, %c0_i32_0 : i32, i32
  }
  func.func @transform_4(%arg0: i32) -> (i32, i32) {
    %c0_i32 = arith.constant 0 : i32
    %c0_i32_0 = arith.constant 0 : i32
    %c0_i32_1 = arith.constant 0 : i32
    return %c0_i32, %c0_i32_0 : i32, i32
  }
  func.func @transform_5(%arg0: i32) -> (i32, i32) {
    %c0_i32 = arith.constant 0 : i32
    %c0_i32_0 = arith.constant 0 : i32
    %c0_i32_1 = arith.constant 0 : i32
    return %c0_i32, %c0_i32_0 : i32, i32
  }
  func.func @transform_6(%arg0: i32) -> (i32, i32) {
    %c0_i32 = arith.constant 0 : i32
    %c0_i32_0 = arith.constant 0 : i32
    %c0_i32_1 = arith.constant 0 : i32
    return %c0_i32, %c0_i32_0 : i32, i32
  }
  func.func @transform_7(%arg0: i32) -> (i32, i32) {
    %c0_i32 = arith.constant 0 : i32
    %c0_i32_0 = arith.constant 0 : i32
    %c0_i32_1 = arith.constant 0 : i32
    return %c0_i32, %c0_i32_0 : i32, i32
  }
  func.func @transform_8(%arg0: i32) -> (i32, i32) {
    %c0_i32 = arith.constant 0 : i32
    %c0_i32_0 = arith.constant 0 : i32
    %c0_i32_1 = arith.constant 0 : i32
    return %c0_i32, %c0_i32_0 : i32, i32
  }
}

</mosaic_0001>

<bundles_post_ra>
// kernel: tile.8
= control target key start
LH: loop header
LB: loop body
LE: loop exit
PB: predicated region body
PF: predicated region fallthrough
CT: control target
= control target key end

     0   :  { %s28_s0 = inlined_call_operand.vmem [shape: f32[8], index: 0, kind: input, shape index: {}]   ;;  %s29_s1 = inlined_call_operand.vmem [shape: f32[16,8], index: 1, kind: output, shape index: {}]  }
   0x1   :  { %v4_v0 = vld [vmem:[%s28_s0] ss:$0 sm:$0xff] }
   0x2   :  { %5 = vst [vmem:[%s29_s1] sm:$0xff] %v4_v0  ;;  %8 = vst [vmem:[%s29_s1 + $0x8] sm:$0xff] %v4_v0 }

// kernel: tile.9
= control target key start
LH: loop header
LB: loop body
LE: loop exit
PB: predicated region body
PF: predicated region fallthrough
CT: control target
= control target key end

     0   :  { %s133_s10 = smov 120   ;;  %s134_s11 = smov 104   ;;  %vm3_vm0 = vcmask 64512   ;;  %vm9_vm1 = vcmask 1048512   ;;  %vm15_vm2 = vcmask 982912   ;;  %vm21_vm3 = vcmask 917312   ;;  %s209_s0 = inlined_call_operand.vmem [shape: f32[16,8], index: 0, kind: input, shape index: {}]   ;;  %s210_s1 = inlined_call_operand.vmem [shape: f32[1,128], index: 1, kind: output, shape index: {}]  }
   0x1   :  { %v103_v0 = vld [vmem:[%s209_s0 + $0xf] sm:$0x1]   ;;  %v105_v1 = vld [vmem:[%s209_s0 + $0xd] sm:$0x1]   ;;  %v104_v2 = vld [vmem:[%s209_s0 + $0xe] sm:$0x1]  }
   0x2   :  { %7 = vrot.lane.b32.xlu0 %v103_v0, %s133_s10  ;;  %19 = vrot.lane.b32.xlu1 %v105_v1, %s134_s11  ;;  %v106_v3 = vld [vmem:[%s209_s0 + $0xc] sm:$0x1]   ;;  %s135_s16 = smov 112   ;;  %s136_s17 = smov 96   ;;  %v107_v4 = vld [vmem:[%s209_s0 + $0xb] sm:$0x1]  }
   0x3   :  { %v108_v5 = vld [vmem:[%s209_s0 + $0xa] sm:$0x1]   ;;  %v2_v6 = vld [vmem:[%s209_s0] sm:$0x1]   ;;  %s137_s24 = smov 88   ;;  %s138_s25 = smov 80  }
   0x4   :  { %4 = vst.msk [vmem:[#allocation0] sm:$0x1] %vm3_vm0, %v2_v6   ;;  %v109_v7 = vld [vmem:[%s209_s0 + $0x9] sm:$0x1]   ;;  %v110_v8 = vld [vmem:[%s209_s0 + $0x8] sm:$0x1]  }
   0x5   :  { %s139_s30 = smov 72   ;;  %s140_s2 = smov 64   ;;  %v111_v9 = vld [vmem:[%s209_s0 + $0x7] sm:$0x1]   ;;  %v112_v10 = vld [vmem:[%s209_s0 + $0x6] sm:$0x1]  }
   0x6   :  { %13 = vrot.lane.b32.xlu0 %v104_v2, %s135_s16  ;;  %25 = vrot.lane.b32.xlu1 %v106_v3, %s136_s17  ;;  %s141_s7 = smov 56   ;;  %s142_s8 = smov 48   ;;  %v113_v11 = vld [vmem:[%s209_s0 + $0x5] sm:$0x1]   ;;  %v114_v12 = vld [vmem:[%s209_s0 + $0x4] sm:$0x1]  }
   0x7   :  { %s143_s13 = smov 40   ;;  %s144_s14 = smov 32   ;;  %v115_v13 = vld [vmem:[%s209_s0 + $0x3] sm:$0x1]   ;;  %v116_v14 = vld [vmem:[%s209_s0 + $0x2] sm:$0x1]  }
   0x8   :  { %s145_s19 = smov 24   ;;  %s146_s20 = smov 16   ;;  %v117_v15 = vld [vmem:[%s209_s0 + $0x1] sm:$0x1]   ;;  %vm27_vm4 = vcmask 851712   ;;  %vm33_vm5 = vcmask 786112  }
   0x9   :  { %s147_s0 = smov 8   ;;  %vm39_vm6 = vcmask 720512   ;;  %vm45_vm7 = vcmask 654912   ;;  %vm51_vm8 = vcmask 589312   ;;  %vm57_vm9 = vcmask 523712  }
   0xa   :  { %31 = vrot.lane.b32.xlu0 %v107_v4, %s137_s24  ;;  %37 = vrot.lane.b32.xlu1 %v108_v5, %s138_s25  ;;  %vm63_vm10 = vcmask 458112   ;;  %vm69_vm11 = vcmask 392512   ;;  %vm75_vm12 = vcmask 326912   ;;  %vm81_vm13 = vcmask 261312  }
   0xb   :  { %vm87_vm14 = vcmask 195712   ;;  %vm93_vm15 = vcmask 130112  }
   0xe   :  { %43 = vrot.lane.b32.xlu0 %v109_v7, %s139_s30  ;;  %49 = vrot.lane.b32.xlu1 %v110_v8, %s140_s2 }
  0x12   :  { %55 = vrot.lane.b32.xlu0 %v111_v9, %s141_s7  ;;  %61 = vrot.lane.b32.xlu1 %v112_v10, %s142_s8 }
  0x16   :  { %67 = vrot.lane.b32.xlu0 %v113_v11, %s143_s13  ;;  %73 = vrot.lane.b32.xlu1 %v114_v12, %s144_s14 }
  0x1a   :  { %79 = vrot.lane.b32.xlu0 %v115_v13, %s145_s19  ;;  %85 = vrot.lane.b32.xlu1 %v116_v14, %s146_s20 }
  0x1e   :  { %91 = vrot.lane.b32.xlu0 %v117_v15, %s147_s0 }
  0x74   :  { %v8_v16 = vpop.permute.xlu0 %7   ;;  %v20_v17 = vpop.permute.xlu1 %19  }
  0x75   :  { %10 = vst.msk [vmem:[#allocation0] sm:$0x1] %vm9_vm1, %v8_v16  }
  0x78   :  { %v14_v18 = vpop.permute.xlu0 %13   ;;  %v26_v19 = vpop.permute.xlu1 %25  }
  0x79   :  { %16 = vst.msk [vmem:[#allocation0] sm:$0x1] %vm15_vm2, %v14_v18  }
  0x7a   :  { %22 = vst.msk [vmem:[#allocation0] sm:$0x1] %vm21_vm3, %v20_v17  }
  0x7b   :  { %28 = vst.msk [vmem:[#allocation0] sm:$0x1] %vm27_vm4, %v26_v19  }
  0x7c   :  { %v32_v20 = vpop.permute.xlu0 %31   ;;  %v38_v21 = vpop.permute.xlu1 %37  }
  0x7d   :  { %34 = vst.msk [vmem:[#allocation0] sm:$0x1] %vm33_vm5, %v32_v20  }
  0x7e   :  { %40 = vst.msk [vmem:[#allocation0] sm:$0x1] %vm39_vm6, %v38_v21  }
  0x80   :  { %v44_v22 = vpop.permute.xlu0 %43   ;;  %v50_v23 = vpop.permute.xlu1 %49  }
  0x81   :  { %46 = vst.msk [vmem:[#allocation0] sm:$0x1] %vm45_vm7, %v44_v22  }
  0x82   :  { %52 = vst.msk [vmem:[#allocation0] sm:$0x1] %vm51_vm8, %v50_v23  }
  0x84   :  { %v56_v24 = vpop.permute.xlu0 %55   ;;  %v62_v25 = vpop.permute.xlu1 %61  }
  0x85   :  { %58 = vst.msk [vmem:[#allocation0] sm:$0x1] %vm57_vm9, %v56_v24  }
  0x86   :  { %64 = vst.msk [vmem:[#allocation0] sm:$0x1] %vm63_vm10, %v62_v25  }
  0x88   :  { %v68_v26 = vpop.permute.xlu0 %67   ;;  %v74_v27 = vpop.permute.xlu1 %73  }
  0x89   :  { %70 = vst.msk [vmem:[#allocation0] sm:$0x1] %vm69_vm11, %v68_v26  }
  0x8a   :  { %76 = vst.msk [vmem:[#allocation0] sm:$0x1] %vm75_vm12, %v74_v27  }
  0x8c   :  { %v80_v28 = vpop.permute.xlu0 %79   ;;  %v86_v29 = vpop.permute.xlu1 %85  }
  0x8d   :  { %82 = vst.msk [vmem:[#allocation0] sm:$0x1] %vm81_vm13, %v80_v28  }
  0x8e   :  { %88 = vst.msk [vmem:[#allocation0] sm:$0x1] %vm87_vm14, %v86_v29  }
  0x90   :  { %v92_v30 = vpop.permute.xlu0 %91  }
  0x91   :  { %94 = vst.msk [vmem:[#allocation0] sm:$0x1] %vm93_vm15, %v92_v30  }
  0x98   :  { %v99_v31 = vld [vmem:[#allocation0] sm:$0x1] }
  0x99   :  { %102 = vst [vmem:[%s210_s1] sm:$0x1] %v99_v31 }

// kernel: node_forward.1
= control target key start
LH: loop header
LB: loop body
LE: loop exit
PB: predicated region body
PF: predicated region fallthrough
CT: control target
= control target key end

     0   :  { %vm63_vm0 = vcmask 392192   ;;  %vm487_vm1 = vcmask 588800   ;;  %vm1445_vm2 = vmmov 0   ;;  %vm856_vm7 = vcmask 1040384   ;;  %s1844_s1 = inlined_call_operand.vmem [shape: f32[4,48,72], index: 1, kind: input, shape index: {}]   ;;  %s1845_s0 = inlined_call_operand.vmem [shape: f32[2,4,16,48], index: 0, kind: input, shape index: {}]   ;;  %s1846_s2 = inlined_call_operand.vmem [shape: f32[3,72,128], index: 2, kind: input, shape index: {}]   ;;  %s1847_s6 = inlined_call_operand.vmem [shape: f32[128,8], index: 6, kind: input, shape index: {}]   ;;  %s1848_s3 = inlined_call_operand.vmem [shape: f32[1,128], index: 3, kind: input, shape index: {}]   ;;  %s1849_s7 = inlined_call_operand.vmem [shape: f32[8,128], index: 7, kind: input, shape index: {}]   ;;  %s1850_s4 = inlined_call_operand.vmem [shape: f32[1,8], index: 4, kind: input, shape index: {}]   ;;  %s1851_s5 = inlined_call_operand.vmem [shape: f32[1,8], index: 5, kind: input, shape index: {}]   ;;  %s1852_s8 = inlined_call_operand.vmem [shape: f32[32,128], index: 8, kind: output, shape index: {}]  }
   0x1   :  { %v1096_v0 = vld [vmem:[%s1844_s1 + $0x58] sm:$0xff]  ;;  %v55_v1 = vld [vmem:[%s1844_s1 + $0x28] sm:$0xff]  ;;  %v1095_v2 = vld [vmem:[%s1844_s1 + $0x50] sm:$0xff]  ;;  %vm989_vm8 = vcmask 64512  }
   0x2   :  { %1255 = vmatprep.subr.mxu0 %v1096_v0  ;;  %1273 = vmatprep.subr.mxu1 %v55_v1  ;;  %v54_v3 = vld [vmem:[%s1844_s1 + $0x20] sm:$0xff]  ;;  %v1094_v4 = vld [vmem:[%s1844_s1 + $0x48] sm:$0xff]  ;;  %v53_v5 = vld [vmem:[%s1844_s1 + $0x18] sm:$0xff] }
   0x3   :  { %1256 = vmatpush3.msra.mxu0 %v1096_v0  ;;  %1274 = vmatpush3.msra.mxu1 %v55_v1  ;;  %v1093_v6 = vld [vmem:[%s1844_s1 + $0x40] sm:$0xff]  ;;  %v52_v7 = vld [vmem:[%s1844_s1 + $0x10] sm:$0xff]  ;;  %v1092_v8 = vld [vmem:[%s1844_s1 + $0x38] sm:$0xff] }
   0x4   :  { %1257 = vmatprep.subr.mxu0 %v1095_v2  ;;  %1275 = vmatprep.subr.mxu1 %v54_v3  ;;  %v51_v9 = vld [vmem:[%s1844_s1 + $0x8] sm:$0xff]  ;;  %v1091_v10 = vld [vmem:[%s1844_s1 + $0x30] sm:$0xff]  ;;  %v50_v11 = vld [vmem:[%s1844_s1] sm:$0xff] }
   0x5   :  { %1258 = vmatpush3.msra.mxu0 %v1095_v2  ;;  %1276 = vmatpush3.msra.mxu1 %v54_v3  ;;  %v36_v12 = vld [vmem:[%s1845_s0 + $0x10] sm:$0xff]  ;;  %v34_v13 = vld [vmem:[%s1845_s0] sm:$0xff]  ;;  %v37_v14 = vld [vmem:[%s1845_s0 + $0x18] sm:$0xff] }
   0x6   :  { %1259 = vmatprep.subr.mxu0 %v1094_v4  ;;  %1277 = vmatprep.subr.mxu1 %v53_v5  ;;  %v35_v15 = vld [vmem:[%s1845_s0 + $0x8] sm:$0xff]  ;;  %v1120_v17 = vld [vmem:[%s1844_s1 + $0xb8] sm:$0xff]  ;;  %v1109_v18 = vld [vmem:[%s1844_s1 + $0x80] sm:$0xff] }
   0x7   :  { %1260 = vmatpush3.msra.mxu0 %v1094_v4  ;;  %1278 = vmatpush3.msra.mxu1 %v53_v5  ;;  %v1110_v16 = vld [vmem:[%s1844_s1 + $0x88] sm:$0xff]  ;;  %v1119_v19 = vld [vmem:[%s1844_s1 + $0xb0] sm:$0xff]  ;;  %v1108_v20 = vld [vmem:[%s1844_s1 + $0x78] sm:$0xff] }
   0x8   :  { %1261 = vmatprep.subr.mxu0 %v1093_v6  ;;  %1279 = vmatprep.subr.mxu1 %v52_v7  ;;  %v1118_v21 = vld [vmem:[%s1844_s1 + $0xa8] sm:$0xff]  ;;  %v44_v22 = vld [vmem:[%s1845_s0 + $0x50] sm:$0xff]  ;;  %v42_v23 = vld [vmem:[%s1845_s0 + $0x40] sm:$0xff] }
   0x9   :  { %1262 = vmatpush3.msra.mxu0 %v1093_v6  ;;  %1280 = vmatpush3.msra.mxu1 %v52_v7  ;;  %v45_v24 = vld [vmem:[%s1845_s0 + $0x58] sm:$0xff]  ;;  %v43_v25 = vld [vmem:[%s1845_s0 + $0x48] sm:$0xff]  ;;  %v1107_v26 = vld [vmem:[%s1844_s1 + $0x70] sm:$0xff] }
   0xa   :  { %1263 = vmatprep.subr.mxu0 %v1092_v8  ;;  %1281 = vmatprep.subr.mxu1 %v51_v9  ;;  %v1117_v27 = vld [vmem:[%s1844_s1 + $0xa0] sm:$0xff]  ;;  %v1106_v28 = vld [vmem:[%s1844_s1 + $0x68] sm:$0xff]  ;;  %v1116_v29 = vld [vmem:[%s1844_s1 + $0x98] sm:$0xff] }
   0xb   :  { %1264 = vmatpush3.msra.mxu0 %v1092_v8  ;;  %1282 = vmatpush3.msra.mxu1 %v51_v9  ;;  %v1105_v30 = vld [vmem:[%s1844_s1 + $0x60] sm:$0xff]  ;;  %v1115_v31 = vld [vmem:[%s1844_s1 + $0x90] sm:$0xff]  ;;  %v39_v34 = vld [vmem:[%s1845_s0 + $0x28] sm:$0xff] }
   0xc   :  { %1265 = vmatprep.subr.mxu0 %v1091_v10  ;;  %1283 = vmatprep.subr.mxu1 %v50_v11  ;;  %v38_v32 = vld [vmem:[%s1845_s0 + $0x20] sm:$0xff]  ;;  %v40_v33 = vld [vmem:[%s1845_s0 + $0x30] sm:$0xff]  ;;  %v41_v35 = vld [vmem:[%s1845_s0 + $0x38] sm:$0xff] }
   0xd   :  { %1266 = vmatpush3.msra.mxu0 %v1091_v10  ;;  %1267 = vmatprep.mubr.msk.f32.mxu0 %vm63_vm0, %v36_v12  ;;  %v46_v36 = vld [vmem:[%s1845_s0 + $0x60] sm:$0xff]  ;;  %v48_v37 = vld [vmem:[%s1845_s0 + $0x70] sm:$0xff]  ;;  %v47_v38 = vld [vmem:[%s1845_s0 + $0x68] sm:$0xff] }
   0xe   :  { %1284 = vmatpush3.msra.mxu1 %v50_v11  ;;  %1285 = vmatprep.mubr.msk.f32.mxu1 %vm63_vm0, %v34_v13  ;;  %v49_v39 = vld [vmem:[%s1845_s0 + $0x78] sm:$0xff]  ;;  %v486_v40 = vld [vmem:[%s1846_s2 + $0x40] sm:$0xff]  ;;  %v1137_v41 = vld [vmem:[%s1846_s2 + $0x88] sm:$0xff] }
   0xf   :  { %1268 = vmatmul.mubr.msk.f32.vlgmr.msra.gmra.mxu0 %vm63_vm0, %v37_v14  ;;  %1286 = vmatmul.mubr.msk.f32.vlgmr.msra.gmra.mxu1 %vm63_vm0, %v35_v15  ;;  %v485_v42 = vld [vmem:[%s1846_s2 + $0x38] sm:$0xff]  ;;  %v1136_v43 = vld [vmem:[%s1846_s2 + $0x80] sm:$0xff]  ;;  %v484_v44 = vld [vmem:[%s1846_s2 + $0x30] sm:$0xff] }
  0x10   :  { %1291 = vmatprep.subr.mxu0 %v1110_v16  ;;  %1309 = vmatprep.subr.mxu1 %v1120_v17  ;;  %v1135_v45 = vld [vmem:[%s1846_s2 + $0x78] sm:$0xff]  ;;  %v483_v46 = vld [vmem:[%s1846_s2 + $0x28] sm:$0xff]  ;;  %v1134_v47 = vld [vmem:[%s1846_s2 + $0x70] sm:$0xff] }
  0x11   :  { %1292 = vmatpush3.msra.mxu0 %v1110_v16  ;;  %1310 = vmatpush3.msra.mxu1 %v1120_v17  ;;  %v482_v48 = vld [vmem:[%s1846_s2 + $0x20] sm:$0xff]  ;;  %v1133_v49 = vld [vmem:[%s1846_s2 + $0x68] sm:$0xff]  ;;  %v481_v50 = vld [vmem:[%s1846_s2 + $0x18] sm:$0xff] }
  0x12   :  { %1293 = vmatprep.subr.mxu0 %v1109_v18  ;;  %1311 = vmatprep.subr.mxu1 %v1119_v19  ;;  %v1132_v51 = vld [vmem:[%s1846_s2 + $0x60] sm:$0xff]  ;;  %v480_v52 = vld [vmem:[%s1846_s2 + $0x10] sm:$0xff]  ;;  %v1131_v53 = vld [vmem:[%s1846_s2 + $0x58] sm:$0xff] }
  0x13   :  { %1294 = vmatpush3.msra.mxu0 %v1109_v18  ;;  %1312 = vmatpush3.msra.mxu1 %v1119_v19  ;;  %v479_v54 = vld [vmem:[%s1846_s2 + $0x8] sm:$0xff]  ;;  %v1130_v55 = vld [vmem:[%s1846_s2 + $0x50] sm:$0xff]  ;;  %v478_v56 = vld [vmem:[%s1846_s2] sm:$0xff] }
  0x14   :  { %1295 = vmatprep.subr.mxu0 %v1108_v20  ;;  %1313 = vmatprep.subr.mxu1 %v1118_v21  ;;  %v1129_v57 = vld [vmem:[%s1846_s2 + $0x48] sm:$0xff]  ;;  %v1150_v58 = vld [vmem:[%s1846_s2 + $0xd0] sm:$0xff] }
  0x15   :  { %1270 = vmatprep.mubr.msk.f32.mxu0 %vm63_vm0, %v44_v22  ;;  %1288 = vmatprep.mubr.msk.f32.mxu1 %vm63_vm0, %v42_v23 }
  0x16   :  { %1296 = vmatpush3.msra.mxu0 %v1108_v20  ;;  %1314 = vmatpush3.msra.mxu1 %v1118_v21 }
  0x17   :  { %1271 = vmatmul.mubr.msk.f32.gmra.mxu0 %vm63_vm0, %v45_v24  ;;  %1289 = vmatmul.mubr.msk.f32.gmra.mxu1 %vm63_vm0, %v43_v25  ;;  %v1149_v25 = vld [vmem:[%s1846_s2 + $0xc8] sm:$0xff] }
  0x18   :  { %1297 = vmatprep.subr.mxu0 %v1107_v26  ;;  %1315 = vmatprep.subr.mxu1 %v1117_v27 }
  0x19   :  { %1298 = vmatpush3.msra.mxu0 %v1107_v26  ;;  %1316 = vmatpush3.msra.mxu1 %v1117_v27  ;;  %v1148_v27 = vld [vmem:[%s1846_s2 + $0xc0] sm:$0xff] }
  0x1a   :  { %1299 = vmatprep.subr.mxu0 %v1106_v28  ;;  %1317 = vmatprep.subr.mxu1 %v1116_v29 }
  0x1b   :  { %1300 = vmatpush3.msra.mxu0 %v1106_v28  ;;  %1318 = vmatpush3.msra.mxu1 %v1116_v29  ;;  %v1147_v29 = vld [vmem:[%s1846_s2 + $0xb8] sm:$0xff] }
  0x1c   :  { %1301 = vmatprep.subr.mxu0 %v1105_v30  ;;  %1319 = vmatprep.subr.mxu1 %v1115_v31 }
  0x1d   :  { %1302 = vmatpush3.msra.mxu0 %v1105_v30  ;;  %1303 = vmatprep.mubr.msk.f32.mxu0 %vm63_vm0, %v38_v32  ;;  %v1146_v30 = vld [vmem:[%s1846_s2 + $0xb0] sm:$0xff]  ;;  %v1144_v32 = vld [vmem:[%s1846_s2 + $0xa0] sm:$0xff] }
  0x1e   :  { %1320 = vmatpush3.msra.mxu1 %v1115_v31  ;;  %1321 = vmatprep.mubr.msk.f32.mxu1 %vm63_vm0, %v40_v33  ;;  %v1145_v31 = vld [vmem:[%s1846_s2 + $0xa8] sm:$0xff]  ;;  %v1143_v33 = vld [vmem:[%s1846_s2 + $0x98] sm:$0xff] }
  0x1f   :  { %1304 = vmatmul.mubr.msk.f32.vlgmr.msra.gmra.mxu0 %vm63_vm0, %v39_v34  ;;  %1322 = vmatmul.mubr.msk.f32.vlgmr.msra.gmra.mxu1 %vm63_vm0, %v41_v35  ;;  %v1142_v34 = vld [vmem:[%s1846_s2 + $0x90] sm:$0xff]  ;;  %v1444_v35 = vmov 0.0  }
  0x20   :  { %1306 = vmatprep.mubr.msk.f32.mxu0 %vm63_vm0, %v46_v36  ;;  %1324 = vmatprep.mubr.msk.f32.mxu1 %vm63_vm0, %v48_v37  ;;  %33 = vst [vmem:[#allocation2] sm:$0x3] %v1444_v35  ;;  %v879_v36 = vld [vmem:[%s1847_s6 + $0x78] sm:$0xff]  ;;  %v878_v37 = vld [vmem:[%s1847_s6 + $0x70] sm:$0xff] }
  0x21   :  { %1327 = vmatprep.subr.mxu0 %v486_v40  ;;  %1351 = vmatprep.subr.mxu1 %v1137_v41 }
  0x22   :  { %1328 = vmatpush3.msra.mxu0 %v486_v40  ;;  %1352 = vmatpush3.msra.mxu1 %v1137_v41  ;;  %v875_v40 = vld [vmem:[%s1847_s6 + $0x58] sm:$0xff]  ;;  %v874_v41 = vld [vmem:[%s1847_s6 + $0x50] sm:$0xff] }
  0x23   :  { %1307 = vmatmul.mubr.msk.f32.gmra.mxu0 %vm63_vm0, %v47_v38  ;;  %1325 = vmatmul.mubr.msk.f32.gmra.mxu1 %vm63_vm0, %v49_v39  ;;  %v877_v38 = vld [vmem:[%s1847_s6 + $0x68] sm:$0xff]  ;;  %v876_v39 = vld [vmem:[%s1847_s6 + $0x60] sm:$0xff] }
  0x24   :  { %1329 = vmatprep.subr.mxu0 %v485_v42  ;;  %1353 = vmatprep.subr.mxu1 %v1136_v43 }
  0x25   :  { %1330 = vmatpush3.msra.mxu0 %v485_v42  ;;  %1354 = vmatpush3.msra.mxu1 %v1136_v43  ;;  %v873_v42 = vld [vmem:[%s1847_s6 + $0x48] sm:$0xff]  ;;  %v872_v43 = vld [vmem:[%s1847_s6 + $0x40] sm:$0xff] }
  0x26   :  { %1331 = vmatprep.subr.mxu0 %v484_v44  ;;  %1355 = vmatprep.subr.mxu1 %v1135_v45 }
  0x27   :  { %1332 = vmatpush3.msra.mxu0 %v484_v44  ;;  %1356 = vmatpush3.msra.mxu1 %v1135_v45  ;;  %v871_v44 = vld [vmem:[%s1847_s6 + $0x38] sm:$0xff]  ;;  %v870_v45 = vld [vmem:[%s1847_s6 + $0x30] sm:$0xff] }
  0x28   :  { %1333 = vmatprep.subr.mxu0 %v483_v46  ;;  %1357 = vmatprep.subr.mxu1 %v1134_v47 }
  0x29   :  { %1334 = vmatpush3.msra.mxu0 %v483_v46  ;;  %1358 = vmatpush3.msra.mxu1 %v1134_v47  ;;  %v869_v46 = vld [vmem:[%s1847_s6 + $0x28] sm:$0xff]  ;;  %v868_v47 = vld [vmem:[%s1847_s6 + $0x20] sm:$0xff] }
  0x2a   :  { %1335 = vmatprep.subr.mxu0 %v482_v48  ;;  %1359 = vmatprep.subr.mxu1 %v1133_v49 }
  0x2b   :  { %1336 = vmatpush3.msra.mxu0 %v482_v48  ;;  %1360 = vmatpush3.msra.mxu1 %v1133_v49  ;;  %v867_v48 = vld [vmem:[%s1847_s6 + $0x18] sm:$0xff]  ;;  %v866_v49 = vld [vmem:[%s1847_s6 + $0x10] sm:$0xff] }
  0x2c   :  { %1337 = vmatprep.subr.mxu0 %v481_v50  ;;  %1361 = vmatprep.subr.mxu1 %v1132_v51 }
  0x2d   :  { %1338 = vmatpush3.msra.mxu0 %v481_v50  ;;  %1362 = vmatpush3.msra.mxu1 %v1132_v51  ;;  %v865_v50 = vld [vmem:[%s1847_s6 + $0x8] sm:$0xff]  ;;  %v864_v51 = vld [vmem:[%s1847_s6] sm:$0xff] }
  0x2e   :  { %1339 = vmatprep.subr.mxu0 %v480_v52  ;;  %1363 = vmatprep.subr.mxu1 %v1131_v53 }
  0x2f   :  { %1340 = vmatpush3.msra.mxu0 %v480_v52  ;;  %1364 = vmatpush3.msra.mxu1 %v1131_v53 }
  0x30   :  { %1341 = vmatprep.subr.mxu0 %v479_v54  ;;  %1365 = vmatprep.subr.mxu1 %v1130_v55 }
  0x31   :  { %1342 = vmatpush3.msra.mxu0 %v479_v54  ;;  %1366 = vmatpush3.msra.mxu1 %v1130_v55  ;;  %v775_v55 = vlaneseq }
  0x32   :  { %1343 = vmatprep.subr.mxu0 %v478_v56  ;;  %1367 = vmatprep.subr.mxu1 %v1129_v57 }
  0x33   :  { %1344 = vmatpush3.msra.mxu0 %v478_v56  ;;  %1368 = vmatpush3.msra.mxu1 %v1129_v57  ;;  %v1769_v57 = vshrl.u32 %v775_v55, 7 }
  0x34   :  { %1375 = vmatprep.subr.mxu0 %v1150_v58  ;;  %1399 = vmatprep.subr.mxu1 %v1444_v35 }
  0x35   :  { %vm784_vm3 = vcmp.lt.s32.totalorder %v1769_v57, 1  ;;  %vm778_vm4 = vcmp.eq.s32.totalorder %v1769_v57, 0  ;;  %vm799_vm5 = vcmp.lt.s32.totalorder %v1769_v57, 7 }
  0xcf   :  { %v1269_v59 = vpop.f32.mrf.mxu0  ;;  %v1287_v60 = vpop.f32.mrf.mxu1 }
  0xd0   :  { %v245_v3 = vadd.f32 %v1287_v60, %v1269_v59 }
  0xd1   :  { %v142_v61 = vpop.f32.mrf.mxu0  ;;  %v239_v62 = vpop.f32.mrf.mxu1 }
  0xd2   :  { %v240_v6 = vadd.f32 %v239_v62, %v142_v61 }
  0xd7   :  { %v1272_v63 = vpop.f32.mrf.mxu0  ;;  %v1290_v0 = vpop.f32.mrf.mxu1 }
  0xd8   :  { %v255_v10 = vadd.f32 %v1290_v0, %v1272_v63 }
  0xd9   :  { %v152_v1 = vpop.f32.mrf.mxu0  ;;  %v249_v2 = vpop.f32.mrf.mxu1 }
  0xda   :  { %v250_v15 = vadd.f32 %v249_v2, %v152_v1 }
  0xdf   :  { %v1305_v4 = vpop.f32.mrf.mxu0  ;;  %v1323_v5 = vpop.f32.mrf.mxu1 }
  0xe0   :  { %v363_v7 = vadd.f32 %v1305_v4, %v245_v3  ;;  %v777_v4 = vadd.s32 8, %v1769_v57 }
  0xe1   :  { %v343_v8 = vpop.f32.mrf.mxu0  ;;  %v451_v9 = vpop.f32.mrf.mxu1 }
  0xe2   :  { %v362_v11 = vadd.f32 %v343_v8, %v240_v6  ;;  %v471_v12 = vadd.f32 %v1323_v5, %v363_v7  ;;  %v1155_v5 = vld [vmem:[%s1848_s3] ss:$0 sm:$0xff]  ;;  %vm794_vm6 = vcmp.eq.s32.totalorder %v777_v4, 15 }
  0xe3   :  { %v1308_v13 = vpop.f32.mrf.mxu0  ;;  %v1326_v14 = vpop.f32.mrf.mxu1 }
  0xe4   :  { %v470_v16 = vadd.f32 %v451_v9, %v362_v11  ;;  %v365_v17 = vadd.f32 %v1308_v13, %v255_v10  ;;  %v475_v22 = vmax.f32 %v471_v12, 0.0 }
  0xe5   :  { %v353_v18 = vpop.f32.mrf.mxu0  ;;  %v461_v19 = vpop.f32.mrf.mxu1 }
  0xe6   :  { %v474_v20 = vmax.f32 %v470_v16, 0.0  ;;  %v364_v21 = vadd.f32 %v353_v18, %v250_v15  ;;  %v473_v23 = vadd.f32 %v1326_v14, %v365_v17 }
  0xe8   :  { %v472_v24 = vadd.f32 %v461_v19, %v364_v21  ;;  %1345 = vmatprep.mubr.msk.f32.mxu0 %vm487_vm1, %v474_v20  ;;  %1369 = vmatprep.mubr.msk.f32.mxu1 %vm487_vm1, %v474_v20  ;;  %v477_v28 = vmax.f32 %v473_v23, 0.0 }
  0xe9   :  { %1346 = vmatmul.mubr.msk.f32.vlgmr.msra.gmra.mxu0 %vm487_vm1, %v475_v22  ;;  %1370 = vmatmul.mubr.msk.f32.vlgmr.msra.gmra.mxu1 %vm487_vm1, %v475_v22 }
  0xea   :  { %v476_v26 = vmax.f32 %v472_v24, 0.0  ;;  %1376 = vmatpush3.msra.mxu0 %v1150_v58  ;;  %1400 = vmatpush3.msra.mxu1 %v879_v36 }
  0xeb   :  { %1377 = vmatprep.subr.mxu0 %v1149_v25  ;;  %1401 = vmatprep.subr.mxu1 %v1444_v35 }
  0xec   :  { %1378 = vmatpush3.msra.mxu0 %v1149_v25  ;;  %1348 = vmatprep.mubr.msk.f32.mxu0 %vm487_vm1, %v476_v26 }
  0xed   :  { %1372 = vmatprep.mubr.msk.f32.mxu1 %vm487_vm1, %v476_v26  ;;  %1379 = vmatprep.subr.mxu0 %v1148_v27 }
  0xee   :  { %1349 = vmatmul.mubr.msk.f32.gmra.mxu0 %vm487_vm1, %v477_v28  ;;  %1373 = vmatmul.mubr.msk.f32.gmra.mxu1 %vm487_vm1, %v477_v28 }
  0xef   :  { %1380 = vmatpush3.msra.mxu0 %v1148_v27  ;;  %1393 = vmatprep.mubr.msk.f32.mxu0 %vm487_vm1, %v474_v20 }
  0xf0   :  { %1381 = vmatprep.subr.mxu0 %v1147_v29  ;;  %1402 = vmatpush3.msra.mxu1 %v878_v37 }
  0xf1   :  { %1382 = vmatpush3.msra.mxu0 %v1147_v29  ;;  %1403 = vmatprep.subr.mxu1 %v1444_v35 }
  0xf2   :  { %1383 = vmatprep.subr.mxu0 %v1146_v30  ;;  %1404 = vmatpush3.msra.mxu1 %v877_v38 }
  0xf3   :  { %1384 = vmatpush3.msra.mxu0 %v1146_v30  ;;  %1405 = vmatprep.subr.mxu1 %v1444_v35 }
  0xf4   :  { %1385 = vmatprep.subr.mxu0 %v1145_v31  ;;  %1406 = vmatpush3.msra.mxu1 %v876_v39 }
  0xf5   :  { %1386 = vmatpush3.msra.mxu0 %v1145_v31  ;;  %1407 = vmatprep.subr.mxu1 %v1444_v35 }
  0xf6   :  { %1387 = vmatprep.subr.mxu0 %v1144_v32  ;;  %1408 = vmatpush3.msra.mxu1 %v875_v40 }
  0xf7   :  { %1388 = vmatpush3.msra.mxu0 %v1144_v32  ;;  %1409 = vmatprep.subr.mxu1 %v1444_v35 }
  0xf8   :  { %1389 = vmatprep.subr.mxu0 %v1143_v33  ;;  %1410 = vmatpush3.msra.mxu1 %v874_v41 }
  0xf9   :  { %1390 = vmatpush3.msra.mxu0 %v1143_v33  ;;  %1411 = vmatprep.subr.mxu1 %v1444_v35 }
  0xfa   :  { %1391 = vmatprep.subr.mxu0 %v1142_v34  ;;  %1412 = vmatpush3.msra.mxu1 %v873_v42 }
  0xfb   :  { %1392 = vmatpush3.msra.mxu0 %v1142_v34  ;;  %1413 = vmatprep.subr.mxu1 %v1444_v35 }
  0xfc   :  { %1394 = vmatmul.mubr.msk.f32.vlgmr.msra.gmra.mxu0 %vm487_vm1, %v475_v22  ;;  %1434 = vmatprep.subr.mxu0 %v1444_v35 }
  0xfd   :  { %1396 = vmatprep.mubr.msk.f32.mxu0 %vm487_vm1, %v476_v26  ;;  %1414 = vmatpush3.msra.mxu1 %v872_v43 }
  0xfe   :  { %1415 = vmatprep.subr.mxu1 %v1444_v35  ;;  %1431 = vmatprep.mubr.msk.f32.mxu1 %vm1445_vm2, %v1444_v35 }
  0xff   :  { %1416 = vmatpush3.msra.mxu1 %v871_v44 }
 0x100   :  { %1397 = vmatmul.mubr.msk.f32.gmra.mxu0 %vm487_vm1, %v477_v28  ;;  %1417 = vmatprep.subr.mxu1 %v1444_v35 }
 0x101   :  { %1418 = vmatpush3.msra.mxu1 %v870_v45  ;;  %1436 = vmatprep.mubr.msk.f32.mxu0 %vm1445_vm2, %v1444_v35 }
 0x102   :  { %1419 = vmatprep.subr.mxu1 %v1444_v35 }
 0x103   :  { %1420 = vmatpush3.msra.mxu1 %v869_v46 }
 0x104   :  { %1421 = vmatprep.subr.mxu1 %v1444_v35 }
 0x105   :  { %1422 = vmatpush3.msra.mxu1 %v868_v47 }
 0x106   :  { %1423 = vmatprep.subr.mxu1 %v1444_v35 }
 0x107   :  { %1424 = vmatpush3.msra.mxu1 %v867_v48 }
 0x108   :  { %1425 = vmatprep.subr.mxu1 %v1444_v35 }
 0x109   :  { %1426 = vmatpush3.msra.mxu1 %v866_v49 }
 0x10a   :  { %1427 = vmatprep.subr.mxu1 %v1444_v35 }
 0x10b   :  { %1428 = vmatpush3.msra.mxu1 %v865_v50 }
 0x10c   :  { %1429 = vmatprep.subr.mxu1 %v1444_v35 }
 0x10d   :  { %1430 = vmatpush3.msra.mxu1 %v864_v51 }
 0x1a9   :  { %v1347_v52 = vpop.f32.mrf.mxu0  ;;  %v1371_v54 = vpop.f32.mrf.mxu1 }
 0x1aa   :  { %v781_v1 = vrot.slane %v1347_v52, 7  ;;  %v816_v15 = vadd.f32 %v1371_v54, %v1155_v5 }
 0x1ab   :  { %v566_v53 = vpop.f32.mrf.mxu0  ;;  %v661_v58 = vpop.f32.mrf.mxu1 }
 0x1ac   :  { %v780_v61 = vrot.slane %v566_v53, 7  ;;  %v815_v13 = vadd.f32 %v1155_v5, %v661_v58 }
 0x1ae   :  { %v1350_v56 = vpop.f32.mrf.mxu0  ;;  %v1374_v63 = vpop.f32.mrf.mxu1  ;;  %v787_v12 = vsel %vm784_vm3, %v780_v61, %v781_v1 }
 0x1af   :  { %v783_v60 = vrot.slane %v1350_v56, 7  ;;  %v820_v23 = vadd.f32 %v816_v15, %v787_v12  ;;  %v818_v24 = vadd.f32 %v1374_v63, %v1155_v5  ;;  %v988_v63 = vld [vmem:[%s1849_s7] sm:$0xff] }
 0x1b0   :  { %v576_v59 = vpop.f32.mrf.mxu0  ;;  %v671_v8 = vpop.f32.mrf.mxu1  ;;  %1435 = vmatpush3.msra.mxu0 %v988_v63 }
 0x1b1   :  { %v782_v62 = vrot.slane %v576_v59, 7  ;;  %v788_v2 = vsel %vm784_vm3, %v783_v60, %v780_v61  ;;  %v817_v19 = vadd.f32 %v1155_v5, %v671_v8  ;;  %v855_v59 = vld [vmem:[#allocation2] sm:$0x3] }
 0x1b2   :  { %v789_v9 = vsel %vm778_vm4, 0.0, %v788_v2 }
 0x1b3   :  { %v786_v6 = vsel %vm784_vm3, %v781_v1, %v782_v62  ;;  %v819_v20 = vadd.f32 %v815_v13, %v789_v9  ;;  %v785_v25 = vsel %vm784_vm3, %v782_v62, %v783_v60 }
 0x1b4   :  { %v791_v16 = vsel %vm778_vm4, 0.0, %v786_v6  ;;  %v822_v32 = vadd.f32 %v818_v24, %v785_v25 }
 0x1b5   :  { %v821_v26 = vadd.f32 %v817_v19, %v791_v16  ;;  %v984_v19 = vsub.s32 0, %v1769_v57 }
 0x1bc   :  { %v1395_v0 = vpop.f32.mrf.mxu0 }
 0x1bd   :  { %v796_v10 = vrot.slane %v1395_v0, 1 }
 0x1be   :  { %v756_v3 = vpop.f32.mrf.mxu0 }
 0x1bf   :  { %v795_v7 = vrot.slane %v756_v3, 1 }
 0x1c0   :  { %v1398_v11 = vpop.f32.mrf.mxu0 }
 0x1c1   :  { %v798_v14 = vrot.slane %v1398_v11, 1  ;;  %v802_v17 = vsel %vm799_vm5, %v795_v7, %v796_v10 }
 0x1c2   :  { %v766_v18 = vpop.f32.mrf.mxu0  ;;  %v1790_v27 = vadd.f32 %v819_v20, %v802_v17  ;;  %v978_v17 = vld [vmem:[%s1851_s5] sm:$0x1] }
 0x1c3   :  { %v803_v21 = vsel %vm799_vm5, %v798_v14, %v795_v7  ;;  %v797_v22 = vrot.slane %v766_v18, 1  ;;  %v1446_v7 = vmov 1966171168  }
 0x1c4   :  { %v807_v30 = vsel %vm794_vm6, 0.0, %v803_v21  ;;  %v842_v35 = vmul.f32 %v1790_v27, %v1790_v27  ;;  %v962_v8 = vunpack.c.l.s4 %v1446_v7 }
 0x1c5   :  { %v800_v28 = vsel %vm799_vm5, %v797_v22, %v798_v14  ;;  %v801_v29 = vsel %vm799_vm5, %v796_v10, %v797_v22  ;;  %v1802_v36 = vadd.f32 %v822_v32, %v807_v30  ;;  %v957_v14 = vld [vmem:[%s1850_s4] sm:$0x1] }
 0x1c6   :  { %v805_v31 = vsel %vm794_vm6, 0.0, %v801_v29  ;;  %v1798_v34 = vadd.f32 %v821_v26, %v800_v28  ;;  %v963_v9 = vunpack.c.0.s8 %v962_v8 }
 0x1c7   :  { %v1796_v33 = vadd.f32 %v820_v23, %v805_v31  ;;  %v845_v42 = vmul.f32 %v1802_v36, %v1802_v36  ;;  %v1077_v23 = vsub.s32 1, %v1769_v57 }
 0x1c8   :  { %v844_v40 = vmul.f32 %v1798_v34, %v1798_v34  ;;  %v966_v10 = vsub.s32 %v963_v9, %v1769_v57 }
 0x1c9   :  { %v833_v37 = vadd.f32 %v1796_v33, %v1790_v27  ;;  %v843_v38 = vmul.f32 %v1796_v33, %v1796_v33 }
 0x1cb   :  { %v834_v39 = vadd.f32 %v833_v37, %v1798_v34  ;;  %v846_v41 = vadd.f32 %v843_v38, %v842_v35 }
 0x1cd   :  { %v835_v43 = vadd.f32 %v834_v39, %v1802_v36  ;;  %v847_v44 = vadd.f32 %v846_v41, %v844_v40 }
 0x1cf   :  { %v836_v45 = vrot.slane %v835_v43, 4  ;;  %v848_v46 = vadd.f32 %v847_v44, %v845_v42 }
 0x1d1   :  { %v837_v47 = vadd.f32 %v836_v45, %v835_v43  ;;  %v849_v48 = vrot.slane %v848_v46, 4 }
 0x1d3   :  { %v838_v49 = vrot.slane %v837_v47, 2  ;;  %v850_v50 = vadd.f32 %v849_v48, %v848_v46 }
 0x1d5   :  { %v839_v51 = vadd.f32 %v838_v49, %v837_v47  ;;  %v851_v52 = vrot.slane %v850_v50, 2 }
 0x1d7   :  { %v840_v53 = vrot.slane %v839_v51, 1  ;;  %v852_v54 = vadd.f32 %v851_v52, %v850_v50 }
 0x1d9   :  { %v853_v55 = vrot.slane %v852_v54, 1  ;;  %v841_v56 = vadd.f32 %v840_v53, %v839_v51 }
 0x1db   :  { %v854_v58 = vadd.f32 %v853_v55, %v852_v54 }
 0x1dd   :  { %v857_v60 = vsel %vm856_vm7, %v841_v56, %v854_v58 }
 0x1de   :  { %v858_v61 = vadd.f32 %v857_v60, %v855_v59 }
 0x1e0   :  { %859 = vst [vmem:[#allocation2] sm:$0x3] %v858_v61 }
 0x1e7   :  { %v863_v62 = vld [vmem:[#allocation2] sm:$0x3] }
 0x1e8   :  { %1432 = vmatmul.mubr.f32.vlgmr.msra.gmra.mxu1 %v863_v62 }
 0x2a8   :  { %v946_v0 = vpop.f32.mrf.mxu1 }
 0x2a9   :  { %v951_v1 = vmul.f32 0.001953125, %v946_v0 }
 0x2aa   :  { %v1433_v2 = vpop.f32.mrf.mxu1 }
 0x2ab   :  { %v952_v3 = vmul.f32 %v951_v1, %v951_v1 }
 0x2ad   :  { %v954_v4 = vrot.slane %v952_v3, 7 }
 0x2af   :  { %v956_v5 = vsub.f32 %v951_v1, %v954_v4 }
 0x2b1   :  { %v958_v6 = vadd.f32 1e-05, %v956_v5 }
 0x2b3   :  { %1442 = vrsqrt.f32 %v958_v6 }
 0x2c0   :  { %v1443_v11 = vpop.eup %1442 }
 0x2c1   :  { %v967_v12 = vrot.slane %v1443_v11, %v966_v10 }
 0x2c3   :  { %v968_v13 = vcombine.high %v967_v12, %v967_v12 }
 0x2c5   :  { %v975_v15 = vrot.slane %v968_v13, %v966_v10 }
 0x2c7   :  { %v977_v16 = vmul.f32 %v975_v15, %v957_v14 }
 0x2c9   :  { %v979_v18 = vmul.f32 %v977_v16, %v951_v1 }
 0x2cb   :  { %v980_v20 = vsub.f32 %v978_v17, %v979_v18 }
 0x2cd   :  { %v985_v21 = vrot.slane %v980_v20, %v984_v19 }
 0x2cf   :  { %v987_v22 = vsel %vm856_vm7, %v977_v16, %v985_v21 }
 0x2d0   :  { %1437 = vmatmul.mubr.msk.f32.vlgmr.msra.gmra.mxu0 %vm989_vm8, %v987_v22 }
 0x390   :  { %v1059_v24 = vpop.f32.mrf.mxu0 }
 0x391   :  { %v1070_v25 = vrot.slane %v1059_v24, %v984_v19  ;;  %v1078_v26 = vrot.slane %v1059_v24, %v1077_v23 }
 0x392   :  { %v1438_v28 = vpop.f32.mrf.mxu0 }
 0x393   :  { %v1071_v29 = vmul.f32 %v1070_v25, %v1790_v27  ;;  %v1072_v30 = vmul.f32 %v1070_v25, %v1796_v33  ;;  %v1073_v31 = vmul.f32 %v1070_v25, %v1798_v34  ;;  %v1074_v32 = vmul.f32 %v1070_v25, %v1802_v36 }
 0x395   :  { %v1079_v35 = vadd.f32 %v1078_v26, %v1071_v29  ;;  %v1080_v37 = vadd.f32 %v1078_v26, %v1072_v30  ;;  %v1081_v38 = vadd.f32 %v1078_v26, %v1073_v31  ;;  %v1082_v39 = vadd.f32 %v1078_v26, %v1074_v32 }
 0x397   :  { %1083 = vst [vmem:[%s1852_s8] sm:$0xff] %v1079_v35  ;;  %1084 = vst [vmem:[%s1852_s8 + $0x8] sm:$0xff] %v1080_v37 }
 0x398   :  { %1085 = vst [vmem:[%s1852_s8 + $0x10] sm:$0xff] %v1081_v38  ;;  %1086 = vst [vmem:[%s1852_s8 + $0x18] sm:$0xff] %v1082_v39 }

</bundles_post_ra>
